<compile_context>
chip_gen: v6e
topology: v6e:2x2x1
jax: 0.10.0
libtpu: 0.0.40
codegen_flags: <defaults>
</compile_context>

<pallas_src>
import functools

import jax
import jax.numpy as jnp
from jax import lax
from jax.experimental import pallas as pl
from jax.experimental.pallas import tpu as pltpu


def residual_block_kernel(xcol_ref, w_ref, g_ref, b_ref, o_ref, *, inv_t):
    # xcol_ref : (1, 3*C_in, T_pad)  bf16  im2col'd, zero-padded in time
    # w_ref    : (C_out, 3*C_in)     bf16  flattened conv taps (k-major columns)
    # g_ref    : (1, C_out, 1)       f32   gamma(c) per batch element
    # b_ref    : (1, C_out, 1)       f32   beta(c)  per batch element
    # o_ref    : (1, C_out//2, T_pad) f32

    # Conv1d(k=3, s=1, p=1, no bias) as ONE MXU matmul with f32 accumulation.
    y = jnp.dot(w_ref[...], xcol_ref[0],
                preferred_element_type=jnp.float32)          # (C_out, T_pad)

    # Instance-norm stats over the valid time region. Padded columns of x_col
    # are zero and the conv has no bias, so padded columns of y are exactly
    # zero -> plain sums over T_pad equal sums over the true T.
    s1 = jnp.sum(y, axis=1, keepdims=True)                   # (C_out, 1)
    s2 = jnp.sum(y * y, axis=1, keepdims=True)               # (C_out, 1)
    u = s1 * inv_t
    var = s2 * inv_t - u * u

    gamma = g_ref[0]                                         # (C_out, 1)
    beta = b_ref[0]                                          # (C_out, 1)

    # Fused conditional instance norm: h = y*scale + shift (rsqrt on the EUP).
    scale = gamma * lax.rsqrt(var + 1e-8)
    shift = beta - u * scale
    h = y * scale + shift                                    # (C_out, T_pad)

    # GLU along channels: first half * sigmoid(second half).
    half = o_ref.shape[1]
    a = h[:half, :]
    gate = h[half:, :]
    sig = pl.reciprocal(1.0 + jnp.exp(-gate), approx=True)   # EUP exp + EUP recip
    o_ref[0] = a * sig


def residual_block(x, c, conv_w, gamma_w, gamma_b, beta_w, beta_b):
    B, C_in, T = x.shape
    C_out = conv_w.shape[0]
    assert C_out % 2 == 0

    # Lane-dense time axis (multiple of 128) for unmasked vector stores.
    T_pad = pl.cdiv(T, 128) * 128

    # --- XLA-side glue (cheap, done once per call) -------------------------
    # im2col: x_col[b, k*C_in + ci, t] = x_zeropad[b, ci, t + k],  t in [0, T)
    xz = jnp.pad(x, ((0, 0), (0, 0), (1, 1)))                       # (B, C_in, T+2)
    x_col = jnp.concatenate([xz[:, :, k:k + T] for k in range(3)], axis=1)
    x_col = jnp.pad(x_col, ((0, 0), (0, 0), (0, T_pad - T)))
    x_col = x_col.astype(jnp.bfloat16)                              # (B, 3*C_in, T_pad)

    # Flatten conv taps to match the k-major im2col row order.
    w_flat = jnp.transpose(conv_w, (0, 2, 1)).reshape(C_out, 3 * C_in)
    w_flat = w_flat.astype(jnp.bfloat16)                            # (C_out, 3*C_in)

    # Tiny style linears hoisted out of the kernel; pre-shaped column vectors.
    gamma = (c @ gamma_w.T + gamma_b).astype(jnp.float32).reshape(B, C_out, 1)
    beta = (c @ beta_w.T + beta_b).astype(jnp.float32).reshape(B, C_out, 1)

    grid_spec = pltpu.PrefetchScalarGridSpec(
        num_scalar_prefetch=0,
        grid=(B,),
        in_specs=[
            pl.BlockSpec((1, 3 * C_in, T_pad), lambda b: (b, 0, 0)),
            pl.BlockSpec((C_out, 3 * C_in), lambda b: (0, 0)),
            pl.BlockSpec((1, C_out, 1), lambda b: (b, 0, 0)),
            pl.BlockSpec((1, C_out, 1), lambda b: (b, 0, 0)),
        ],
        out_specs=pl.BlockSpec((1, C_out // 2, T_pad), lambda b: (b, 0, 0)),
    )

    out_padded = pl.pallas_call(
        functools.partial(residual_block_kernel, inv_t=1.0 / float(T)),
        out_shape=jax.ShapeDtypeStruct((B, C_out // 2, T_pad), jnp.float32),
        grid_spec=grid_spec,
        compiler_params=pltpu.CompilerParams(
            dimension_semantics=("parallel",),      # batch across TCs (v7x megacore)
            vmem_limit_bytes=32 * 1024 * 1024,      # explicit, safe on v5e/v6e/v7x
        ),
    )(x_col, w_flat, gamma, beta)

    return out_padded[:, :, :T]


def reference(x, c, conv_w, gamma_w, gamma_b, beta_w, beta_b):
    """Pure-JAX f32 reference matching the PyTorch forward semantics."""
    y = lax.conv_general_dilated(
        x, conv_w, window_strides=(1,), padding=((1, 1),),
        dimension_numbers=("NCH", "OIH", "NCH"))
    u = jnp.mean(y, axis=2, keepdims=True)
    var = jnp.mean((y - u) ** 2, axis=2, keepdims=True)
    std = jnp.sqrt(var + 1e-8)
    gamma = c @ gamma_w.T + gamma_b
    beta = c @ beta_w.T + beta_b
    h = (y - u) / std * gamma[:, :, None] + beta[:, :, None]
    half = y.shape[1] // 2
    return h[:, :half] * jax.nn.sigmoid(h[:, half:])


if __name__ == "__main__":
    B, dim_in, dim_out, style_num, T = 2, 4, 8, 4, 16

    key = jax.random.PRNGKey(0)
    k_x, k_c, k_w, k_gw, k_gb, k_bw, k_bb = jax.random.split(key, 7)

    x = jax.random.normal(k_x, (B, dim_in, T), jnp.float32)
    c = jax.random.normal(k_c, (B, style_num), jnp.float32)

    # Deterministic synthetic parameters (shapes from the module __init__).
    conv_w = 0.2 * jax.random.normal(k_w, (dim_out, dim_in, 3), jnp.float32)
    gamma_w = 0.2 * jax.random.normal(k_gw, (dim_out, style_num), jnp.float32)
    gamma_b = 0.1 * jax.random.normal(k_gb, (dim_out,), jnp.float32)
    beta_w = 0.2 * jax.random.normal(k_bw, (dim_out, style_num), jnp.float32)
    beta_b = 0.1 * jax.random.normal(k_bb, (dim_out,), jnp.float32)

    out = residual_block(x, c, conv_w, gamma_w, gamma_b, beta_w, beta_b)
    out = jax.block_until_ready(out)

    ref = reference(x, c, conv_w, gamma_w, gamma_b, beta_w, beta_b)
    assert out.shape == (B, dim_out // 2, T)
    # Tolerance accounts for bf16 MXU inputs (f32 accumulation) and the
    # approximate EUP reciprocal in the GLU sigmoid.
    assert jnp.allclose(out, ref, atol=2e-2, rtol=2e-2), \
        f"max err {jnp.max(jnp.abs(out - ref))}"

    print("KERNEL_OK")
</pallas_src>

<mosaic_0001>
module attributes {stable_mosaic.version = 11 : i64} {
  func.func @residual_block_kernel(%arg0: i32, %arg1: memref<1x12x128xbf16, #tpu.memory_space<vmem>>, %arg2: memref<8x12xbf16, #tpu.memory_space<vmem>>, %arg3: memref<1x8x1xf32, #tpu.memory_space<vmem>>, %arg4: memref<1x8x1xf32, #tpu.memory_space<vmem>>, %arg5: memref<1x4x128xf32, #tpu.memory_space<vmem>>) attributes {dimension_semantics = [#tpu.dimension_semantics<parallel>], iteration_bounds = array<i64: 2>, scalar_prefetch = 0 : i64, scratch_operands = 0 : i64, tpu.core_type = #tpu.core_type<tc>, window_params = [{transform_indices = @transform_0, window_bounds = array<i64: 1, 12, 128>}, {pipeline_mode = #tpu.pipeline_mode<synchronous>, transform_indices = @transform_1, window_bounds = array<i64: 8, 12>}, {transform_indices = @transform_2, window_bounds = array<i64: 1, 8, 1>}, {transform_indices = @transform_3, window_bounds = array<i64: 1, 8, 1>}, {transform_indices = @transform_4, window_bounds = array<i64: 1, 4, 128>}]} {
    %c0 = arith.constant 0 : index
    %c0_0 = arith.constant 0 : index
    %0 = vector.load %arg2[%c0, %c0_0] : memref<8x12xbf16, #tpu.memory_space<vmem>>, vector<8x12xbf16>
    %c0_1 = arith.constant 0 : index
    %c0_2 = arith.constant 0 : index
    %c0_3 = arith.constant 0 : index
    %1 = vector.load %arg1[%c0_1, %c0_2, %c0_3] : memref<1x12x128xbf16, #tpu.memory_space<vmem>>, vector<1x12x128xbf16>
    %2 = vector.shape_cast %1 : vector<1x12x128xbf16> to vector<12x128xbf16>
    %cst = arith.constant dense<0.000000e+00> : vector<8x128xf32>
    %3 = tpu.matmul %0, %2, %cst {dimension_numbers = #tpu.dot_dimension_numbers<[1], [0], [0], [1], [0, 0, 1, 1], [], []>} : vector<8x12xbf16>, vector<12x128xbf16>, vector<8x128xf32> -> vector<8x128xf32>
    %cst_4 = arith.constant dense<0.000000e+00> : vector<8xf32>
    %4 = vector.multi_reduction <add>, %3, %cst_4 [1] : vector<8x128xf32> to vector<8xf32>
    %5 = vector.shape_cast %4 : vector<8xf32> to vector<8x1xf32>
    %6 = arith.mulf %3, %3 : vector<8x128xf32>
    %cst_5 = arith.constant dense<0.000000e+00> : vector<8xf32>
    %7 = vector.multi_reduction <add>, %6, %cst_5 [1] : vector<8x128xf32> to vector<8xf32>
    %8 = vector.shape_cast %7 : vector<8xf32> to vector<8x1xf32>
    %cst_6 = arith.constant 6.250000e-02 : f32
    %9 = vector.broadcast %cst_6 : f32 to vector<8x1xf32>
    %10 = arith.mulf %5, %9 : vector<8x1xf32>
    %cst_7 = arith.constant 6.250000e-02 : f32
    %11 = vector.broadcast %cst_7 : f32 to vector<8x1xf32>
    %12 = arith.mulf %8, %11 : vector<8x1xf32>
    %13 = arith.mulf %10, %10 : vector<8x1xf32>
    %14 = arith.subf %12, %13 : vector<8x1xf32>
    %c0_8 = arith.constant 0 : index
    %c0_9 = arith.constant 0 : index
    %c0_10 = arith.constant 0 : index
    %15 = vector.load %arg3[%c0_8, %c0_9, %c0_10] : memref<1x8x1xf32, #tpu.memory_space<vmem>>, vector<1x8x1xf32>
    %16 = vector.shape_cast %15 : vector<1x8x1xf32> to vector<8x1xf32>
    %c0_11 = arith.constant 0 : index
    %c0_12 = arith.constant 0 : index
    %c0_13 = arith.constant 0 : index
    %17 = vector.load %arg4[%c0_11, %c0_12, %c0_13] : memref<1x8x1xf32, #tpu.memory_space<vmem>>, vector<1x8x1xf32>
    %18 = vector.shape_cast %17 : vector<1x8x1xf32> to vector<8x1xf32>
    %cst_14 = arith.constant 9.99999993E-9 : f32
    %19 = vector.broadcast %cst_14 : f32 to vector<8x1xf32>
    %20 = arith.addf %14, %19 : vector<8x1xf32>
    %21 = math.rsqrt %20 : vector<8x1xf32>
    %22 = arith.mulf %16, %21 : vector<8x1xf32>
    %23 = arith.mulf %10, %22 : vector<8x1xf32>
    %24 = arith.subf %18, %23 : vector<8x1xf32>
    %25 = vector.broadcast %22 : vector<8x1xf32> to vector<8x128xf32>
    %26 = arith.mulf %3, %25 : vector<8x128xf32>
    %27 = vector.broadcast %24 : vector<8x1xf32> to vector<8x128xf32>
    %28 = arith.addf %26, %27 : vector<8x128xf32>
    %29 = vector.extract_strided_slice %28 {offsets = [0, 0], sizes = [4, 128], strides = [1, 1]} : vector<8x128xf32> to vector<4x128xf32>
    %30 = vector.extract_strided_slice %28 {offsets = [4, 0], sizes = [4, 128], strides = [1, 1]} : vector<8x128xf32> to vector<4x128xf32>
    %cst_15 = arith.constant 0.000000e+00 : f32
    %31 = vector.broadcast %cst_15 : f32 to vector<4x128xf32>
    %32 = arith.subf %31, %30 : vector<4x128xf32>
    %33 = math.exp %32 : vector<4x128xf32>
    %cst_16 = arith.constant 1.000000e+00 : f32
    %34 = vector.broadcast %cst_16 : f32 to vector<4x128xf32>
    %35 = arith.addf %34, %33 : vector<4x128xf32>
    %36 = tpu.reciprocal %35 {approx = true} : vector<4x128xf32> -> vector<4x128xf32>
    %37 = arith.mulf %29, %36 : vector<4x128xf32>
    %c0_17 = arith.constant 0 : index
    %c0_18 = arith.constant 0 : index
    %c0_19 = arith.constant 0 : index
    %38 = vector.load %arg5[%c0_17, %c0_18, %c0_19] : memref<1x4x128xf32, #tpu.memory_space<vmem>>, vector<1x4x128xf32>
    %39 = vector.shape_cast %38 : vector<1x4x128xf32> to vector<4x128xf32>
    %40 = vector.shape_cast %37 : vector<4x128xf32> to vector<1x4x128xf32>
    tpu.vector_store %arg5[%c0_17, %c0_18, %c0_19], %40 {strides = array<i32>} : memref<1x4x128xf32, #tpu.memory_space<vmem>>, vector<1x4x128xf32>,
    return
  }
  func.func @transform_0(%arg0: i32) -> (i32, i32, i32) {
    %c0_i32 = arith.constant 0 : i32
    %c0_i32_0 = arith.constant 0 : i32
    %c0_i32_1 = arith.constant 0 : i32
    return %arg0, %c0_i32, %c0_i32_0 : i32, i32, i32
  }
  func.func @transform_1(%arg0: i32) -> (i32, i32) {
    %c0_i32 = arith.constant 0 : i32
    %c0_i32_0 = arith.constant 0 : i32
    %c0_i32_1 = arith.constant 0 : i32
    return %c0_i32, %c0_i32_0 : i32, i32
  }
  func.func @transform_2(%arg0: i32) -> (i32, i32, i32) {
    %c0_i32 = arith.constant 0 : i32
    %c0_i32_0 = arith.constant 0 : i32
    %c0_i32_1 = arith.constant 0 : i32
    return %arg0, %c0_i32, %c0_i32_0 : i32, i32, i32
  }
  func.func @transform_3(%arg0: i32) -> (i32, i32, i32) {
    %c0_i32 = arith.constant 0 : i32
    %c0_i32_0 = arith.constant 0 : i32
    %c0_i32_1 = arith.constant 0 : i32
    return %arg0, %c0_i32, %c0_i32_0 : i32, i32, i32
  }
  func.func @transform_4(%arg0: i32) -> (i32, i32, i32) {
    %c0_i32 = arith.constant 0 : i32
    %c0_i32_0 = arith.constant 0 : i32
    %c0_i32_1 = arith.constant 0 : i32
    return %arg0, %c0_i32, %c0_i32_0 : i32, i32, i32
  }
}

</mosaic_0001>

<bundles_post_ra>
// kernel: tpu_custom_call.1
= control target key start
LH: loop header
LB: loop body
LE: loop exit
PB: predicated region body
PF: predicated region fallthrough
CT: control target
= control target key end

     0   :  { %9 = vsyncpa [#allocation3], 0  ;;  %s689_s0 = inlined_call_operand.vmem [shape: bf16[2,12,128], index: 0, kind: input, shape index: {}]   ;;  %s690_s1 = inlined_call_operand.vmem [shape: bf16[8,12], index: 1, kind: input, shape index: {}]   ;;  %s691_s2 = inlined_call_operand.vmem [shape: f32[2,8,1], index: 2, kind: input, shape index: {}]   ;;  %s692_s3 = inlined_call_operand.vmem [shape: f32[2,8,1], index: 3, kind: input, shape index: {}]   ;;  %s693_s4 = inlined_call_operand.hbm [shape: f32[2,4,128], index: 4, kind: output, shape index: {}]  }
   0x1   :  { %11 = vsyncpa [#allocation3 + $0x1], 0  ;;  %s588_s15 = smov 0   ;;  %s590_s16 = smov 0  }
   0x2   :  { %s592_s17 = smov 0   ;;  %s594_s18 = smov 0  }
   0x3 LB: > { %s609_s19 = sadd.s32 4294967295, %s557_s18   ;;  %s422_s20 = sadd.s32 4294967294, %s557_s18   ;;  %s557_s18 = sphi %s594_s18, %s699_s18   ;;  %s553_s17 = sphi %s592_s17, %s698_s17   ;;  %s549_s16 = sphi %s590_s16, %s697_s16   ;;  %s545_s15 = sphi %s588_s15, %s696_s15  }
   0x4   : > { %s613_s21 = sadd.s32 1, %s557_s18   ;;  %s123_s22 = sadd.s32 1, %s553_s17 }
   0x5   : > { %s120_s23 = ssub.s32 %s557_s18, %s613_s21  ;;  %p133_p0 = scmp.ne.s32.totalorder %s553_s17, %s549_s16 }
   0x6   : > { %p121_p1 = scmp.eq.s32.totalorder %s120_s23, 0  ;;  %p134_p2 = scmp.eq.s32.totalorder %s609_s19, 1 }
   0x7   : > { %p139_p3 = scmp.ne.s32.totalorder %s549_s16, %s545_s15  ;;  %p140_p4 = scmp.eq.s32.totalorder %s422_s20, 1 }
   0x8   : > { %s624_s24 = scalar_select %p121_p1, %s553_s17, %s123_s22  }
   0x9   : > { %p626_p5 = por %p134_p2, %p133_p0  ;;  %p630_p6 = por %p140_p4, %p139_p3 }
   0xa   : > { %p425_p7 = scmp.ge.s32.totalorder %s557_s18, 1  ;;  %p183_p8 = scmp.lt.s32.totalorder %s557_s18, 3 }
   0xc   : > { %p184_p9 = pnand %p425_p7, %p183_p8 }
   0xd   : > { %p217_p10 = scmp.lt.s32.totalorder (!%p184_p9), %s609_s19, 1  ;;  %s214_s14 = sand.u32 (!%p184_p9), 1, %s549_s16  }
   0xe   : > { %187 = sbr.rel (%p184_p9) target bundleno = 566 (0x236), region = 36  ;;  %s426_s20 = sshll.u32 (!%p184_p9), %s214_s14, 2 }
   0xf   : > { %s434_s22 = sshll.u32 (!%p184_p9), %s609_s19, 6  ;;  %s216_s23 = scalar_lea.vmem (!%p184_p9), [#allocation2], %s426_s20 }
  0x10   : > { %s337_s30 = scalar_lea.hbm (!%p184_p9), %s693_s4, %s434_s22  ;;  %s562_s7 = smov (!%p184_p9), [#allocation2]  }
  0x11   : > { %s501_s8 = sshll.u32 (!%p184_p9), %s562_s7, 4  ;;  %s502_s8 = int_to_ptr.vmem [resolvable:$false] %s501_s8 }
  0x13   : > { %v559_v0 = vmov 0.0   ;;  %vm560_vm0 = vmmov 0   ;;  %s218_s27 = scalar_select %p217_p10, %s609_s19, 1  ;;  %vm243_vm1 = vcmask 1045504   ;;  %v231_v3 = vld [vmem:[%s690_s1] sm:$0xf] }
  0x14   : > { %440 = vmatprep.subr.bf16.mxu0 %v559_v0  ;;  %442 = vmatprep.mubr.msk.bf16.mxu0 %vm560_vm0, %v559_v0  ;;  %vm239_vm2 = vcmask 97280   ;;  %v561_v9 = vmov 0   ;;  %s503_s19 = scalar_lea.vmem %s502_s8, 128 }
  0x15   : > { %s638_s28 = sshll.u32 %s218_s27, 3  ;;  %488 = vset.pattern.permute.xlu1 %v561_v9  ;;  %489 = vset.pattern.permute.xlu0 %v561_v9  ;;  %s339_s27 = sshll.u32 %s216_s23, 4  ;;  %s340_s27 = int_to_ptr.vmem [resolvable:$true] %s339_s27 }
  0x16   : > { %s221_s5 = scalar_lea.vmem %s689_s0, %s638_s28  ;;  %s225_s10 = scalar_lea.vmem %s691_s2, %s638_s28 }
  0x17   : > { %v490_v1 = vld [vmem:[%s221_s5] sm:$0x3f]   ;;  %s229_s13 = scalar_lea.vmem %s692_s3, %s638_s28  ;;  %s326_s5 = scalar_lea.sflag [#allocation3], %s214_s14 }
  0x18   : > { %v245_v2 = vsel %vm243_vm1, %v490_v1, 0  ;;  %v296_v17 = vld [vmem:[%s225_s10] sm:$0xff]  ;;  %s497_s6 = scalar_lea.vmem %s340_s27, 64  ;;  %p504_p0 = scmp.lt.s32.totalorder %s340_s27, %s502_s8 }
  0x19   : > { %441 = vmatpush3.bf16.msra.mxu0 %v245_v2  ;;  %v297_v20 = vld [vmem:[%s229_s13] sm:$0xff]  ;;  %p498_p11 = scmp.ne.s32.totalorder %s340_s27, %s497_s6  ;;  %p505_p1 = scmp.lt.s32.totalorder %s503_s19, %s497_s6 }
  0x1b   : > { %p499_p12 = pnand %p498_p11, %p626_p5  ;;  %p506_p2 = por %p505_p1, %p504_p0 }
  0x1c   : > { %443 = vmatmul.mubr.msk.bf16.vlgmr.msra.gmra.mxu0 %vm239_vm2, %v231_v3 }
  0x1d   : > { %p500_p13 = pneg %p499_p12 }
  0x1f   : > { %p507_p3 = pnand %p506_p2, %p500_p13 }
  0xdc   : > { %v281_v4 = vpop.f32.mrf.mxu0 }
  0xdd   : > { %287 = vadd.xlane.f32.xlu0 %v281_v4  ;;  %v289_v6 = vmul.f32 %v281_v4, %v281_v4 }
  0xde   : > { %v444_v5 = vpop.f32.mrf.mxu0 }
  0xe0   : > { %v284_v7 = vpop.f32.mrf.mxu0 }
  0xe1   : > { %290 = vadd.xlane.f32.xlu0 %v289_v6 }
  0xe2   : > { %v445_v8 = vpop.f32.mrf.mxu0 }
 0x166   : > { %v288_v10 = vpop.xlane.xlu0 %287 }
 0x167   : > { %v292_v11 = vmul.f32 0.0625, %v288_v10 }
 0x169   : > { %v294_v13 = vmul.f32 %v292_v11, %v292_v11 }
 0x16a   : > { %v291_v12 = vpop.xlane.xlu0 %290 }
 0x16b   : > { %v293_v14 = vmul.f32 0.0625, %v291_v12 }
 0x16d   : > { %v295_v15 = vsub.f32 %v293_v14, %v294_v13 }
 0x16f   : > { %v298_v16 = vadd.f32 1e-08, %v295_v15 }
 0x171   : > { %491 = vrsqrt.f32 %v298_v16 }
 0x17e   : > { %v492_v18 = vpop.eup %491 }
 0x17f   : > { %v300_v19 = vmul.f32 %v492_v18, %v296_v17 }
 0x181   : > { %305 = vperm.xlu1 %488, %v300_v19   ;;  %v301_v21 = vmul.f32 %v300_v19, %v292_v11 }
 0x183   : > { %v302_v22 = vsub.f32 %v297_v20, %v301_v21 }
 0x185   : > { %311 = vperm.xlu1 %488, %v302_v22  }
 0x1fc   : > { %v306_v23 = vpop.permute.xlu1 %305 }
 0x1fd   : > { %v308_v24 = vmul.f32 %v306_v23, %v281_v4 }
 0x200   : > { %v312_v25 = vpop.permute.xlu1 %311 }
 0x201   : > { %v314_v26 = vadd.f32 %v312_v25, %v308_v24 }
 0x203   : > { %v315_v27 = vsub.f32 0.0, %v314_v26 }
 0x205   : > { %v316_v28 = vmul.f32 1.442695, %v315_v27 }
 0x207   : > { %493 = vpow2.f32 %v316_v28 }
 0x214   : > { %v494_v29 = vpop.eup %493 }
 0x215   : > { %v318_v30 = vadd.f32 1.0, %v494_v29 }
 0x217   : > { %495 = vrcp.f32 %v318_v30 }
 0x224   : > { %v496_v31 = vpop.eup %495 }
 0x225   : > { %v321_v32 = vrot.slane %v496_v31, 4 }
 0x227   : > { %v323_v33 = vmul.f32 %v321_v32, %v314_v26 }
 0x229   : > { %324 = vst [vmem:[%s216_s23] sm:$0xf] %v323_v33 }
 0x22a   : > { %510 = shalt.err (!%p507_p3)
}
 0x22b   : > { %s511_s9 = scalar_lea.hbm %s337_s30, 64  ;;  %s515_s12 = scalar_lea.hbm %s693_s4, 128 }
 0x22c   : > { %p512_p4 = scmp.ne.s32.totalorder %s337_s30, %s511_s9  ;;  %p516_p9 = scmp.lt.s32.totalorder %s337_s30, %s693_s4 }
 0x22d   : > { %p517_p10 = scmp.lt.s32.totalorder %s515_s12, %s511_s9 }
 0x22e   : > { %p513_p7 = pnand %p512_p4, %p626_p5 }
 0x22f   : > { %p518_p11 = por %p517_p10, %p516_p9 }
 0x230   : > { %p514_p8 = pneg %p513_p7 }
 0x232   : > { %p519_p12 = pnand %p518_p11, %p514_p8 }
 0x234   : > { %522 = shalt.err (!%p519_p12)
}
 0x235   : > { %446 = dma.vmem_to_hbm [thread:$0]  (%p626_p5), %s340_s27, 64, %s337_s30, %s326_s5  }
 0x236 PF: > { %p452_p13 = scmp.ge.s32.totalorder %s557_s18, 2  ;;  %s351_s20 = sand.u32 1, %s545_s15  }
 0x237   : > { %s352_s22 = scalar_lea.sflag [#allocation3], %s351_s20 }
 0x238   : > { %p449_p0 = pnand %p452_p13, %p630_p6 }
 0x23a   : > { %p450_p1 = pneg %p449_p0 }
 0x23c   : > { %540 = dma.done.wait (%p450_p1), %s352_s22, 64  }
 0x23d   : > { %542 = vsyncadd (%p450_p1), %s352_s22, 4294967232  ;;  %p14_p2 = scmp.ge.s32.totalorder %s613_s21, 4   ;;  %s696_s15 = smov %s549_s16 }
 0x23e   : > { %s697_s16 = smov %s553_s17  ;;  %s698_s17 = smov %s624_s24 }
 0x23f   : > { %s699_s18 = smov %s613_s21  ;;  %16 = sbr.rel (!%p14_p2) target bundleno = 3 (0x3), region = 77 }
 0x244   :  { %357 = vsyncpa [#allocation3], 1 }
 0x245   :  { %359 = vsyncpa [#allocation3 + $0x1], 1 }

</bundles_post_ra>
